<compile_context>
chip_gen: v7x
topology: tpu7x:2x2x1
jax: 0.10.0
libtpu: 0.0.40
codegen_flags: <defaults>
</compile_context>

<pallas_src>
import functools

import jax
import jax.numpy as jnp
import numpy as np
from jax import lax
from jax.experimental import pallas as pl
from jax.experimental.pallas import tpu as pltpu


def _round_up(x, m):
    return ((x + m - 1) // m) * m


def _choose_tb(b_pad, d, c):
    # Rough per-row f32 VMEM estimate: double-buffered X tile (2*D) plus a few
    # (TB, C)-wide live temporaries (~4*C).  Budget ~8 MiB per tile so the same
    # choice fits v5e/v6e (128 MiB) and v7x (64 MiB physical / 32 MiB scoped).
    per_row = 4 * (2 * d + 4 * max(c, 1))
    cap = max(8, (8 * 1024 * 1024) // per_row)
    tb = min(512, b_pad, (cap // 8) * 8)
    return max(8, tb)


def _pnca_angle_kernel(x_ref, pt_ref, t_ref, out_ref, *, alpha, mrg,
                       batch, tb, nb_classes):
    pid = pl.program_id(0)

    X = x_ref[...].astype(jnp.float32)            # (TB, D)
    Pt = pt_ref[...].astype(jnp.float32)          # (D, C)  (pre-transposed proxies)
    t = t_ref[...]                                # (TB, 1) int32 labels

    # Row validity: rows past the true batch (tile padding) and labels outside
    # [0, nb_classes) contribute nothing to the positive term / num_valid.
    row = pid * tb + lax.broadcasted_iota(jnp.int32, (tb, 1), 0)
    in_range = row < batch                                            # (TB, 1)
    valid = in_range & (t >= 0) & (t < nb_classes)                    # (TB, 1)

    # F.normalize(..., dim=1, eps=1e-12) via a single rsqrt + VPU multiply.
    x_inv = lax.rsqrt(jnp.maximum(jnp.sum(X * X, axis=1, keepdims=True), 1e-24))
    Xn = X * x_inv                                                    # (TB, D)
    p_inv = lax.rsqrt(jnp.maximum(jnp.sum(Pt * Pt, axis=0, keepdims=True), 1e-24))
    Pn = Pt * p_inv                                                   # (D, C)

    # cos = Xn @ Pn  — single MXU dot in native (no-transpose) layout, f32 acc.
    cos = lax.dot_general(Xn, Pn, (((1,), (0,)), ((), ())),
                          preferred_element_type=jnp.float32)         # (TB, C)

    # Positive cosine per row (exactly one positive class per valid row).
    cls = lax.broadcasted_iota(jnp.int32, (tb, nb_classes), 1)
    pos_mask = t == cls                                               # (TB, C)
    cos_pos = jnp.sum(jnp.where(pos_mask, cos, 0.0),
                      axis=1, keepdims=True)                          # (TB, 1)

    # Negatives: the only (TB, C) exp.  Subtract the positive-class term from
    # the full row sum instead of a second masked (TB, C) select + reduce.
    neg_exp = jnp.exp(alpha * (cos + mrg))                            # (TB, C) EUP
    neg_all = jnp.sum(neg_exp, axis=1, keepdims=True)                 # (TB, 1)
    pos_at_t = jnp.where(valid, jnp.exp(alpha * (cos_pos + mrg)), 0.0)
    n_sim = neg_all - pos_at_t                                        # (TB, 1)

    # Positives: TB exps instead of TB*C.
    p_sim = jnp.where(valid, jnp.exp(-alpha * (cos_pos - mrg)), 0.0)  # (TB, 1)

    pos_sum = jnp.sum(jnp.where(in_range, jnp.log(1.0 + p_sim), 0.0))
    neg_sum = jnp.sum(jnp.where(in_range, jnp.log(1.0 + n_sim), 0.0))
    nv = jnp.sum(valid.astype(jnp.float32))

    # Lane-dense partials row: [pos_logsum, neg_logsum, num_valid, 0, ...].
    lane = lax.broadcasted_iota(jnp.int32, (1, 1, 128), 2)
    out_ref[...] = jnp.where(lane == 0, pos_sum,
                   jnp.where(lane == 1, neg_sum,
                   jnp.where(lane == 2, nv, 0.0)))


def pnca_loss_angle(X, T, P, *, mrg=0.1, alpha=32.0):
    """Forward pass of PNCALoss_Angle as a single batch-tiled Pallas kernel."""
    B, D = X.shape
    C, Dp = P.shape
    assert D == Dp

    T = T.astype(jnp.int32).reshape(B, 1)

    # Pad the batch to a multiple of 8 so the (TB, 1)/(TB, D) tiles are legal;
    # padded rows carry label -1 and are masked out in-kernel.
    B_pad = _round_up(B, 8)
    if B_pad != B:
        X = jnp.pad(X, ((0, B_pad - B), (0, 0)))
        T = jnp.pad(T, ((0, B_pad - B), (0, 0)), constant_values=-1)

    TB = _choose_tb(B_pad, D, C)
    G = pl.cdiv(B_pad, TB)

    Pt = jnp.swapaxes(P, 0, 1)   # (D, C): pure layout plumbing, MXU-native RHS.

    partials = pl.pallas_call(
        functools.partial(_pnca_angle_kernel, alpha=float(alpha), mrg=float(mrg),
                          batch=B, tb=TB, nb_classes=C),
        out_shape=jax.ShapeDtypeStruct((G, 1, 128), jnp.float32),
        grid=(G,),
        in_specs=[pl.BlockSpec((TB, D), lambda i: (i, 0)),     # X tile (pipelined)
                  pl.BlockSpec((D, C), lambda i: (0, 0)),      # proxies, resident
                  pl.BlockSpec((TB, 1), lambda i: (i, 0))],    # labels tile
        out_specs=pl.BlockSpec((1, 1, 128), lambda i: (i, 0, 0)),
        compiler_params=pltpu.CompilerParams(
            dimension_semantics=("parallel",)),
    )(X, Pt, T)

    pos_sum = jnp.sum(partials[:, 0, 0])
    neg_sum = jnp.sum(partials[:, 0, 1])
    num_valid = jnp.maximum(jnp.sum(partials[:, 0, 2]), 1.0)  # guard /0 (NaN hazard)
    return pos_sum / num_valid + neg_sum / float(B)


def _reference(X, T, P, *, mrg=0.1, alpha=32.0):
    """Pure-JAX transcription of the PyTorch forward (correctness check)."""
    Xn = X / jnp.maximum(jnp.linalg.norm(X, axis=1, keepdims=True), 1e-12)
    Pn = P / jnp.maximum(jnp.linalg.norm(P, axis=1, keepdims=True), 1e-12)
    cos = Xn @ Pn.T
    C = P.shape[0]
    one_hot = jax.nn.one_hot(T, C, dtype=jnp.float32)
    pos_exp = jnp.exp(-alpha * (cos - mrg))
    neg_exp = jnp.exp(alpha * (cos + mrg))
    num_valid = jnp.sum((one_hot.sum(axis=1) != 0).astype(jnp.float32))
    p_sim = jnp.sum(jnp.where(one_hot == 1, pos_exp, 0.0), axis=1)
    n_sim = jnp.sum(jnp.where(one_hot == 0, neg_exp, 0.0), axis=1)
    return (jnp.sum(jnp.log(1.0 + p_sim)) / num_valid
            + jnp.sum(jnp.log(1.0 + n_sim)) / X.shape[0])


if __name__ == "__main__":
    key = jax.random.PRNGKey(0)
    kx, kt, kp = jax.random.split(key, 3)

    B, D, C = 16, 32, 8                      # batch, sz_embed, nb_classes
    X = jax.random.normal(kx, (B, D), dtype=jnp.float32)
    T = jax.random.randint(kt, (B,), 0, C, dtype=jnp.int32)
    # Stand-in for the kaiming_normal_(mode='fan_out') proxy parameter.
    P = jax.random.normal(kp, (C, D), dtype=jnp.float32) * float(np.sqrt(2.0 / C))

    loss = pnca_loss_angle(X, T, P)
    jax.block_until_ready(loss)

    ref = _reference(X, T, P)
    assert np.allclose(np.asarray(loss), np.asarray(ref), rtol=1e-3, atol=1e-4), (
        float(loss), float(ref))
    print("KERNEL_OK")
</pallas_src>

<mosaic_0001>
module attributes {stable_mosaic.version = 11 : i64} {
  func.func @_pnca_angle_kernel(%arg0: i32, %arg1: memref<16x32xf32, #tpu.memory_space<vmem>>, %arg2: memref<32x8xf32, #tpu.memory_space<vmem>>, %arg3: memref<16x1xi32, #tpu.memory_space<vmem>>, %arg4: memref<1x1x128xf32, #tpu.memory_space<vmem>>) attributes {dimension_semantics = [#tpu.dimension_semantics<parallel>], iteration_bounds = array<i64: 1>, scalar_prefetch = 0 : i64, scratch_operands = 0 : i64, tpu.core_type = #tpu.core_type<tc>, window_params = [{transform_indices = @transform_0, window_bounds = array<i64: 16, 32>}, {pipeline_mode = #tpu.pipeline_mode<synchronous>, transform_indices = @transform_1, window_bounds = array<i64: 32, 8>}, {transform_indices = @transform_2, window_bounds = array<i64: 16, 1>}, {transform_indices = @transform_3, window_bounds = array<i64: 1, 1, 128>}]} {
    %c0 = arith.constant 0 : index
    %c0_0 = arith.constant 0 : index
    %0 = vector.load %arg1[%c0, %c0_0] : memref<16x32xf32, #tpu.memory_space<vmem>>, vector<16x32xf32>
    %c0_1 = arith.constant 0 : index
    %c0_2 = arith.constant 0 : index
    %1 = vector.load %arg2[%c0_1, %c0_2] : memref<32x8xf32, #tpu.memory_space<vmem>>, vector<32x8xf32>
    %c0_3 = arith.constant 0 : index
    %c0_4 = arith.constant 0 : index
    %2 = vector.load %arg3[%c0_3, %c0_4] : memref<16x1xi32, #tpu.memory_space<vmem>>, vector<16x1xi32>
    %c16_i32 = arith.constant 16 : i32
    %3 = arith.muli %arg0, %c16_i32 : i32
    %4 = tpu.iota {dimensions = array<i32: 0>} : vector<16x1xi32>
    %5 = vector.broadcast %3 : i32 to vector<16x1xi32>
    %6 = arith.addi %5, %4 : vector<16x1xi32>
    %c16_i32_5 = arith.constant 16 : i32
    %7 = vector.broadcast %c16_i32_5 : i32 to vector<16x1xi32>
    %8 = arith.cmpi slt, %6, %7 : vector<16x1xi32>
    %c0_i32 = arith.constant 0 : i32
    %9 = vector.broadcast %c0_i32 : i32 to vector<16x1xi32>
    %10 = arith.cmpi sge, %2, %9 : vector<16x1xi32>
    %11 = arith.andi %8, %10 : vector<16x1xi1>
    %c8_i32 = arith.constant 8 : i32
    %12 = vector.broadcast %c8_i32 : i32 to vector<16x1xi32>
    %13 = arith.cmpi slt, %2, %12 : vector<16x1xi32>
    %14 = arith.andi %11, %13 : vector<16x1xi1>
    %15 = arith.mulf %0, %0 : vector<16x32xf32>
    %cst = arith.constant dense<0.000000e+00> : vector<16xf32>
    %16 = vector.multi_reduction <add>, %15, %cst [1] : vector<16x32xf32> to vector<16xf32>
    %17 = vector.shape_cast %16 : vector<16xf32> to vector<16x1xf32>
    %cst_6 = arith.constant 1.000000e-24 : f32
    %18 = vector.broadcast %cst_6 : f32 to vector<16x1xf32>
    %19 = arith.maximumf %17, %18 : vector<16x1xf32>
    %20 = math.rsqrt %19 : vector<16x1xf32>
    %21 = vector.broadcast %20 : vector<16x1xf32> to vector<16x32xf32>
    %22 = arith.mulf %0, %21 : vector<16x32xf32>
    %23 = arith.mulf %1, %1 : vector<32x8xf32>
    %cst_7 = arith.constant dense<0.000000e+00> : vector<8xf32>
    %24 = vector.multi_reduction <add>, %23, %cst_7 [0] : vector<32x8xf32> to vector<8xf32>
    %25 = vector.shape_cast %24 : vector<8xf32> to vector<1x8xf32>
    %cst_8 = arith.constant 1.000000e-24 : f32
    %26 = vector.broadcast %cst_8 : f32 to vector<1x8xf32>
    %27 = arith.maximumf %25, %26 : vector<1x8xf32>
    %28 = math.rsqrt %27 : vector<1x8xf32>
    %29 = vector.broadcast %28 : vector<1x8xf32> to vector<32x8xf32>
    %30 = arith.mulf %1, %29 : vector<32x8xf32>
    %cst_9 = arith.constant dense<0.000000e+00> : vector<16x8xf32>
    %31 = tpu.matmul %22, %30, %cst_9 {dimension_numbers = #tpu.dot_dimension_numbers<[1], [0], [0], [1], [0, 0, 1, 1], [], []>} : vector<16x32xf32>, vector<32x8xf32>, vector<16x8xf32> -> vector<16x8xf32>
    %32 = tpu.iota {dimensions = array<i32: 1>} : vector<16x8xi32>
    %33 = vector.broadcast %2 : vector<16x1xi32> to vector<16x8xi32>
    %34 = arith.cmpi eq, %33, %32 : vector<16x8xi32>
    %cst_10 = arith.constant 0.000000e+00 : f32
    %35 = vector.broadcast %cst_10 : f32 to vector<16x8xf32>
    %36 = arith.select %34, %31, %35 : vector<16x8xi1>, vector<16x8xf32>
    %cst_11 = arith.constant dense<0.000000e+00> : vector<16xf32>
    %37 = vector.multi_reduction <add>, %36, %cst_11 [1] : vector<16x8xf32> to vector<16xf32>
    %38 = vector.shape_cast %37 : vector<16xf32> to vector<16x1xf32>
    %cst_12 = arith.constant 1.000000e-01 : f32
    %39 = vector.broadcast %cst_12 : f32 to vector<16x8xf32>
    %40 = arith.addf %31, %39 : vector<16x8xf32>
    %cst_13 = arith.constant 3.200000e+01 : f32
    %41 = vector.broadcast %cst_13 : f32 to vector<16x8xf32>
    %42 = arith.mulf %41, %40 : vector<16x8xf32>
    %43 = math.exp %42 : vector<16x8xf32>
    %cst_14 = arith.constant dense<0.000000e+00> : vector<16xf32>
    %44 = vector.multi_reduction <add>, %43, %cst_14 [1] : vector<16x8xf32> to vector<16xf32>
    %45 = vector.shape_cast %44 : vector<16xf32> to vector<16x1xf32>
    %cst_15 = arith.constant 1.000000e-01 : f32
    %46 = vector.broadcast %cst_15 : f32 to vector<16x1xf32>
    %47 = arith.addf %38, %46 : vector<16x1xf32>
    %cst_16 = arith.constant 3.200000e+01 : f32
    %48 = vector.broadcast %cst_16 : f32 to vector<16x1xf32>
    %49 = arith.mulf %48, %47 : vector<16x1xf32>
    %50 = math.exp %49 : vector<16x1xf32>
    %cst_17 = arith.constant 0.000000e+00 : f32
    %51 = vector.broadcast %cst_17 : f32 to vector<16x1xf32>
    %52 = arith.select %14, %50, %51 : vector<16x1xi1>, vector<16x1xf32>
    %53 = arith.subf %45, %52 : vector<16x1xf32>
    %cst_18 = arith.constant 1.000000e-01 : f32
    %54 = vector.broadcast %cst_18 : f32 to vector<16x1xf32>
    %55 = arith.subf %38, %54 : vector<16x1xf32>
    %cst_19 = arith.constant -3.200000e+01 : f32
    %56 = vector.broadcast %cst_19 : f32 to vector<16x1xf32>
    %57 = arith.mulf %56, %55 : vector<16x1xf32>
    %58 = math.exp %57 : vector<16x1xf32>
    %cst_20 = arith.constant 0.000000e+00 : f32
    %59 = vector.broadcast %cst_20 : f32 to vector<16x1xf32>
    %60 = arith.select %14, %58, %59 : vector<16x1xi1>, vector<16x1xf32>
    %cst_21 = arith.constant 1.000000e+00 : f32
    %61 = vector.broadcast %cst_21 : f32 to vector<16x1xf32>
    %62 = arith.addf %61, %60 : vector<16x1xf32>
    %63 = math.log %62 : vector<16x1xf32>
    %cst_22 = arith.constant 0.000000e+00 : f32
    %64 = vector.broadcast %cst_22 : f32 to vector<16x1xf32>
    %65 = arith.select %8, %63, %64 : vector<16x1xi1>, vector<16x1xf32>
    %66 = vector.shape_cast %65 : vector<16x1xf32> to vector<1x16x1xf32>
    %cst_23 = arith.constant dense<0.000000e+00> : vector<1xf32>
    %67 = vector.multi_reduction <add>, %66, %cst_23 [1, 2] : vector<1x16x1xf32> to vector<1xf32>
    %68 = vector.shape_cast %67 : vector<1xf32> to vector<1x1x1xf32>
    %69 = vector.extract %68[0, 0, 0] : f32 from vector<1x1x1xf32>
    %cst_24 = arith.constant 1.000000e+00 : f32
    %70 = vector.broadcast %cst_24 : f32 to vector<16x1xf32>
    %71 = arith.addf %70, %53 : vector<16x1xf32>
    %72 = math.log %71 : vector<16x1xf32>
    %cst_25 = arith.constant 0.000000e+00 : f32
    %73 = vector.broadcast %cst_25 : f32 to vector<16x1xf32>
    %74 = arith.select %8, %72, %73 : vector<16x1xi1>, vector<16x1xf32>
    %75 = vector.shape_cast %74 : vector<16x1xf32> to vector<1x16x1xf32>
    %cst_26 = arith.constant dense<0.000000e+00> : vector<1xf32>
    %76 = vector.multi_reduction <add>, %75, %cst_26 [1, 2] : vector<1x16x1xf32> to vector<1xf32>
    %77 = vector.shape_cast %76 : vector<1xf32> to vector<1x1x1xf32>
    %78 = vector.extract %77[0, 0, 0] : f32 from vector<1x1x1xf32>
    %79 = arith.extui %14 : vector<16x1xi1> to vector<16x1xi32>
    %80 = arith.sitofp %79 : vector<16x1xi32> to vector<16x1xf32>
    %81 = vector.shape_cast %80 : vector<16x1xf32> to vector<1x16x1xf32>
    %cst_27 = arith.constant dense<0.000000e+00> : vector<1xf32>
    %82 = vector.multi_reduction <add>, %81, %cst_27 [1, 2] : vector<1x16x1xf32> to vector<1xf32>
    %83 = vector.shape_cast %82 : vector<1xf32> to vector<1x1x1xf32>
    %84 = vector.extract %83[0, 0, 0] : f32 from vector<1x1x1xf32>
    %85 = tpu.iota {dimensions = array<i32: 2>} : vector<1x1x128xi32>
    %c0_i32_28 = arith.constant 0 : i32
    %86 = vector.broadcast %c0_i32_28 : i32 to vector<1x1x128xi32>
    %87 = arith.cmpi eq, %85, %86 : vector<1x1x128xi32>
    %c1_i32 = arith.constant 1 : i32
    %88 = vector.broadcast %c1_i32 : i32 to vector<1x1x128xi32>
    %89 = arith.cmpi eq, %85, %88 : vector<1x1x128xi32>
    %c2_i32 = arith.constant 2 : i32
    %90 = vector.broadcast %c2_i32 : i32 to vector<1x1x128xi32>
    %91 = arith.cmpi eq, %85, %90 : vector<1x1x128xi32>
    %cst_29 = arith.constant 0.000000e+00 : f32
    %92 = vector.broadcast %84 : f32 to vector<1x1x128xf32>
    %93 = vector.broadcast %cst_29 : f32 to vector<1x1x128xf32>
    %94 = arith.select %91, %92, %93 : vector<1x1x128xi1>, vector<1x1x128xf32>
    %95 = vector.broadcast %78 : f32 to vector<1x1x128xf32>
    %96 = arith.select %89, %95, %94 : vector<1x1x128xi1>, vector<1x1x128xf32>
    %97 = vector.broadcast %69 : f32 to vector<1x1x128xf32>
    %98 = arith.select %87, %97, %96 : vector<1x1x128xi1>, vector<1x1x128xf32>
    %c0_30 = arith.constant 0 : index
    %c0_31 = arith.constant 0 : index
    %c0_32 = arith.constant 0 : index
    %99 = vector.load %arg4[%c0_30, %c0_31, %c0_32] : memref<1x1x128xf32, #tpu.memory_space<vmem>>, vector<1x1x128xf32>
    tpu.vector_store %arg4[%c0_30, %c0_31, %c0_32], %98 {strides = array<i32>} : memref<1x1x128xf32, #tpu.memory_space<vmem>>, vector<1x1x128xf32>,
    return
  }
  func.func @transform_0(%arg0: i32) -> (i32, i32) {
    %c0_i32 = arith.constant 0 : i32
    %c0_i32_0 = arith.constant 0 : i32
    return %arg0, %c0_i32 : i32, i32
  }
  func.func @transform_1(%arg0: i32) -> (i32, i32) {
    %c0_i32 = arith.constant 0 : i32
    %c0_i32_0 = arith.constant 0 : i32
    %c0_i32_1 = arith.constant 0 : i32
    return %c0_i32, %c0_i32_0 : i32, i32
  }
  func.func @transform_2(%arg0: i32) -> (i32, i32) {
    %c0_i32 = arith.constant 0 : i32
    %c0_i32_0 = arith.constant 0 : i32
    return %arg0, %c0_i32 : i32, i32
  }
  func.func @transform_3(%arg0: i32) -> (i32, i32, i32) {
    %c0_i32 = arith.constant 0 : i32
    %c0_i32_0 = arith.constant 0 : i32
    %c0_i32_1 = arith.constant 0 : i32
    return %arg0, %c0_i32, %c0_i32_0 : i32, i32, i32
  }
}

</mosaic_0001>

<bundles_post_ra>
// kernel: tpu_custom_call.1
= control target key start
LH: loop header
LB: loop body
LE: loop exit
PB: predicated region body
PF: predicated region fallthrough
CT: control target
= control target key end

     0   :  { %vm42_vm0 = vcmask 261120   ;;  %vm59_vm1 = vcmask 64512   ;;  %s491_s0 = inlined_call_operand.vmem [shape: f32[16,32], index: 0, kind: input, shape index: {}]   ;;  %s492_s1 = inlined_call_operand.vmem [shape: f32[32,8], index: 1, kind: input, shape index: {}]   ;;  %s493_s2 = inlined_call_operand.vmem [shape: s32[16,1], index: 2, kind: input, shape index: {}]   ;;  %s494_s3 = inlined_call_operand.hbm [shape: f32[1,1,128], index: 3, kind: output, shape index: {}]  }
   0x1   :  { %v15_v0 = vld [vmem:[%s491_s0] sm:$0xff]  ;;  %v16_v1 = vld [vmem:[%s491_s0 + $0x8] sm:$0xff]  ;;  %v19_v6 = vld [vmem:[%s492_s1 + $0x10] sm:$0xff] }
   0x2   :  { %v17_v2 = vld [vmem:[%s492_s1] sm:$0xff]  ;;  %v40_v3 = vmul.f32 %v15_v0, %v15_v0  ;;  %v41_v4 = vmul.f32 %v16_v1, %v16_v1  ;;  %v18_v5 = vld [vmem:[%s492_s1 + $0x8] sm:$0xff]  ;;  %v20_v7 = vld [vmem:[%s492_s1 + $0x18] sm:$0xff]  ;;  %v57_v10 = vmul.f32 %v19_v6, %v19_v6 }
   0x3   :  { %v55_v8 = vmul.f32 %v17_v2, %v17_v2  ;;  %v56_v9 = vmul.f32 %v18_v5, %v18_v5  ;;  %v58_v11 = vmul.f32 %v20_v7, %v20_v7 }
   0x4   :  { %8 = vsyncpa [#allocation3], 0  ;;  %v43_v12 = vsel %vm42_vm0, %v40_v3, 0.0  ;;  %v63_v15 = vsel %vm59_vm1, %v57_v10, 0.0  ;;  %v46_v16 = vsel %vm42_vm0, %v41_v4, 0.0  ;;  %v21_v33 = vld [vmem:[%s493_s2] sm:$0xff]  ;;  %v160_v47 = vlaneseq }
   0x5   :  { %v60_v13 = vsel %vm59_vm1, %v55_v8, 0.0  ;;  %44 = vadd.xlane.f32.xlu0 %v43_v12  ;;  %v61_v14 = vsel %vm59_vm1, %v56_v9, 0.0  ;;  %v65_v18 = vsel %vm59_vm1, %v58_v11, 0.0  ;;  %v387_v36 = vmov 0   ;;  %v22_v37 = vld [vmem:[%s493_s2 + $0x8] sm:$0xff]  ;;  %s389_s28 = smov [#allocation2]  }
   0x6   :  { %v62_v17 = vadd.f32 %v61_v14, %v60_v13  ;;  %335 = vset.pattern.permute.xlu1 %v387_v36  ;;  %336 = vset.pattern.permute.xlu0 %v387_v36  ;;  %v442_v48 = vand.u32 127, %v160_v47  ;;  %vm32_vm4 = vcmp.ge.s32.totalorder %v21_v33, 0  ;;  %vm36_vm5 = vcmp.lt.s32.totalorder %v21_v33, 8  ;;  %s287_s29 = sshll.u32 %s389_s28, 4  ;;  %s288_s29 = int_to_ptr.vmem [resolvable:$true] %s287_s29 }
   0x7   :  { %163 = vperm.xlu1 %335, %v21_v33   ;;  %vm33_vm6 = vcmp.ge.s32.totalorder %v22_v37, 0  ;;  %vm37_vm7 = vcmp.lt.s32.totalorder %v22_v37, 8  ;;  %vm450_vm8 = vmand %vm32_vm4, %vm36_vm5  ;;  %vm222_vm10 = vcmask 7168   ;;  %v388_v4 = vmov 0.0   ;;  %s363_s30 = scalar_lea.vmem %s288_s29, 16  ;;  %s367_s4 = scalar_lea.vmem %s288_s29, 32 }
   0x8   :  { %v64_v19 = vadd.f32 %v63_v15, %v62_v17  ;;  %vm454_vm9 = vmand %vm33_vm6, %vm37_vm7  ;;  %vm273_vm11 = vcmp.eq.s32.totalorder %v442_v48, 2  ;;  %vm272_vm12 = vcmp.eq.s32.totalorder %v442_v48, 1  ;;  %vm271_vm13 = vcmp.eq.s32.totalorder %v442_v48, 0  ;;  %p364_p0 = scmp.ne.s32.totalorder %s288_s29, %s363_s30  ;;  %p368_p1 = scmp.lt.s32.totalorder %s288_s29, %s288_s29 }
   0x9   :  { %47 = vadd.xlane.f32.xlu0 %v46_v16  ;;  %p369_p2 = scmp.lt.s32.totalorder %s367_s4, %s363_s30 }
   0xa   :  { %v66_v20 = vadd.f32 %v65_v18, %v64_v19 }
   0xb   :  { %166 = vperm.xlu1 %335, %v22_v37   ;;  %p370_p3 = por %p369_p2, %p368_p1 }
   0xc   :  { %v67_v21 = vrot.slane %v66_v20, 4 }
   0xd   :  { %p371_p4 = pnand %p370_p3, %p364_p0 }
   0xe   :  { %v68_v22 = vadd.f32 %v67_v21, %v66_v20 }
  0x10   :  { %v69_v23 = vrot.slane %v68_v22, 2 }
  0x12   :  { %v70_v24 = vadd.f32 %v69_v23, %v68_v22 }
  0x14   :  { %v71_v25 = vrot.slane %v70_v24, 1 }
  0x16   :  { %v72_v26 = vadd.f32 %v71_v25, %v70_v24 }
  0x18   :  { %v73_v27 = vmax.f32 %v72_v26, 1e-24 }
  0x1a   :  { %337 = vrsqrt.f32 %v73_v27 }
  0x24   :  { %v338_v28 = vpop.eup %337 }
  0x25   :  { %v75_v29 = vmul.f32 %v338_v28, %v17_v2  ;;  %v76_v30 = vmul.f32 %v338_v28, %v18_v5  ;;  %v77_v31 = vmul.f32 %v338_v28, %v19_v6  ;;  %v78_v32 = vmul.f32 %v338_v28, %v20_v7 }
  0x26   :  { %v299_v5 = vsel %vm450_vm8, 1.0, %v388_v4  ;;  %v300_v6 = vsel %vm454_vm9, 1.0, %v388_v4 }
  0x27   :  { %v318_v34 = vpack.c.bf16 %v76_v30, %v75_v29  ;;  %v322_v35 = vpack.c.bf16 %v78_v32, %v77_v31  ;;  %v259_v7 = vsel %vm222_vm10, %v299_v5, 0.0  ;;  %v260_v8 = vsel %vm222_vm10, %v300_v6, 0.0 }
  0x28   :  { %v261_v9 = vadd.f32 %v260_v8, %v259_v7 }
  0x29   :  { %319 = vmatprep.subr.bf16.mxu0 %v318_v34 }
  0x2a   :  { %321 = vmatpush3.bf16.msra.mxu0 %v318_v34 }
  0x2b   :  { %323 = vmatprep.subr.bf16.mxu0 %v322_v35 }
  0x2e   :  { %325 = vmatpush3.bf16.msra.mxu0 %v322_v35 }
  0x86   :  { %v164_v46 = vpop.permute.xlu1 %163 }
  0x87   :  { %vm168_vm3 = vcmp.eq.s32.totalorder %v164_v46, %v442_v48 }
  0x8a   :  { %v167_v49 = vpop.permute.xlu1 %166 }
  0x8b   :  { %vm169_vm2 = vcmp.eq.s32.totalorder %v167_v49, %v442_v48 }
  0x92   :  { %v45_v38 = vpop.xlane.xlu0 %44 }
  0x93   :  { %v49_v39 = vmax.f32 %v45_v38, 1e-24 }
  0x95   :  { %339 = vrsqrt.f32 %v49_v39 }
  0x96   :  { %v48_v40 = vpop.xlane.xlu0 %47 }
  0x97   :  { %v50_v41 = vmax.f32 %v48_v40, 1e-24 }
  0x99   :  { %341 = vrsqrt.f32 %v50_v41 }
  0x9f   :  { %v340_v42 = vpop.eup %339 }
  0xa0   :  { %v53_v43 = vmul.f32 %v340_v42, %v15_v0 }
  0xa2   :  { %315 = vmatprep.mubr.msk.f32.mxu0 %vm42_vm0, %v53_v43 }
  0xa3   :  { %v342_v44 = vpop.eup %341 }
  0xa4   :  { %v54_v45 = vmul.f32 %v342_v44, %v16_v1 }
  0xa6   :  { %316 = vmatmul.mubr.msk.f32.vlgmr.msra.gmra.mrb[0].mxu0 %vm42_vm0, %v54_v45 }
 0x179   :  { %v317_v50 = vpop.f32.mrb[0].mxu0 }
 0x17a   :  { %v179_v51 = vadd.f32 0.1, %v317_v50  ;;  %v151_v52 = vpop.f32.mrb[1].mxu0  ;;  %v171_v53 = vsel %vm169_vm2, %v317_v50, 0.0 }
 0x17b   :  { %v170_v54 = vsel %vm168_vm3, %v151_v52, 0.0  ;;  %v178_v55 = vadd.f32 0.1, %v151_v52  ;;  %v175_v56 = vsel %vm59_vm1, %v171_v53, 0.0 }
 0x17c   :  { %v181_v57 = vmul.f32 32.0, %v179_v51  ;;  %176 = vadd.xlane.f32.xlu1 %v175_v56  ;;  %v172_v58 = vsel %vm59_vm1, %v170_v54, 0.0 }
 0x17d   :  { %v180_v59 = vmul.f32 32.0, %v178_v55  ;;  %173 = vadd.xlane.f32.xlu0 %v172_v58 }
 0x17e   :  { %v184_v60 = vmul.f32 1.442695, %v181_v57 }
 0x17f   :  { %v182_v61 = vmul.f32 1.442695, %v180_v59 }
 0x181   :  { %343 = vpow2.f32 %v182_v61 }
 0x182   :  { %345 = vpow2.f32 %v184_v60 }
 0x18b   :  { %v344_v62 = vpop.eup %343 }
 0x18c   :  { %v186_v63 = vsel %vm59_vm1, %v344_v62, 0.0  ;;  %v346_v0 = vpop.eup %345 }
 0x18d   :  { %187 = vadd.xlane.f32.xlu0 %v186_v63  ;;  %v189_v1 = vsel %vm59_vm1, %v346_v0, 0.0 }
 0x191   :  { %190 = vadd.xlane.f32.xlu0 %v189_v1 }
 0x209   :  { %v177_v10 = vpop.xlane.xlu1 %176 }
 0x20a   :  { %v193_v11 = vadd.f32 0.1, %v177_v10  ;;  %v298_v12 = vadd.f32 -0.1, %v177_v10  ;;  %v174_v13 = vpop.xlane.xlu0 %173 }
 0x20b   :  { %v192_v14 = vadd.f32 0.1, %v174_v13  ;;  %v297_v15 = vadd.f32 -0.1, %v174_v13 }
 0x20c   :  { %v195_v16 = vmul.f32 32.0, %v193_v11  ;;  %v207_v17 = vmul.f32 -32.0, %v298_v12 }
 0x20d   :  { %v194_v18 = vmul.f32 32.0, %v192_v14  ;;  %v206_v19 = vmul.f32 -32.0, %v297_v15 }
 0x20e   :  { %v198_v20 = vmul.f32 1.442695, %v195_v16  ;;  %v210_v21 = vmul.f32 1.442695, %v207_v17 }
 0x20f   :  { %v196_v22 = vmul.f32 1.442695, %v194_v18  ;;  %v208_v23 = vmul.f32 1.442695, %v206_v19 }
 0x210   :  { %347 = vpow2.f32 %v198_v20 }
 0x211   :  { %349 = vpow2.f32 %v210_v21 }
 0x212   :  { %351 = vpow2.f32 %v196_v22 }
 0x213   :  { %353 = vpow2.f32 %v208_v23 }
 0x21a   :  { %v348_v24 = vpop.eup %347  ;;  %v188_v25 = vpop.xlane.xlu0 %187 }
 0x21b   :  { %v350_v26 = vpop.eup %349  ;;  %v201_v34 = vsel %vm454_vm9, %v348_v24, 0.0 }
 0x21c   :  { %v352_v27 = vpop.eup %351  ;;  %v213_v28 = vsel %vm454_vm9, %v350_v26, 0.0 }
 0x21d   :  { %v354_v29 = vpop.eup %353  ;;  %v200_v30 = vsel %vm450_vm8, %v352_v27, 0.0  ;;  %v215_v31 = vadd.f32 1.0, %v213_v28 }
 0x21e   :  { %v212_v32 = vsel %vm450_vm8, %v354_v29, 0.0  ;;  %v202_v33 = vsub.f32 %v188_v25, %v200_v30  ;;  %v191_v35 = vpop.xlane.xlu0 %190 }
 0x21f   :  { %v214_v36 = vadd.f32 1.0, %v212_v32  ;;  %355 = vlog2.f32 %v215_v31  ;;  %v203_v37 = vsub.f32 %v191_v35, %v201_v34 }
 0x220   :  { %v235_v38 = vadd.f32 1.0, %v202_v33 }
 0x221   :  { %357 = vlog2.f32 %v214_v36  ;;  %v236_v39 = vadd.f32 1.0, %v203_v37 }
 0x222   :  { %359 = vlog2.f32 %v235_v38 }
 0x223   :  { %361 = vlog2.f32 %v236_v39 }
 0x229   :  { %v356_v40 = vpop.eup %355 }
 0x22a   :  { %v219_v41 = vmul.f32 0.6931472, %v356_v40 }
 0x22b   :  { %v358_v42 = vpop.eup %357 }
 0x22c   :  { %v360_v43 = vpop.eup %359  ;;  %v217_v44 = vmul.f32 0.6931472, %v358_v42  ;;  %v224_v45 = vsel %vm222_vm10, %v219_v41, 0.0 }
 0x22d   :  { %v362_v46 = vpop.eup %361  ;;  %v238_v47 = vmul.f32 0.6931472, %v360_v43 }
 0x22e   :  { %v240_v49 = vmul.f32 0.6931472, %v362_v46  ;;  %v223_v50 = vsel %vm222_vm10, %v217_v44, 0.0 }
 0x22f   :  { %v225_v51 = vadd.f32 %v224_v45, %v223_v50  ;;  %v243_v52 = vsel %vm222_vm10, %v238_v47, 0.0 }
 0x230   :  { %v244_v53 = vsel %vm222_vm10, %v240_v49, 0.0 }
 0x231   :  { %226 = vadd.xlane.f32.xlu0 %v225_v51  ;;  %v245_v54 = vadd.f32 %v244_v53, %v243_v52 }
 0x235   :  { %246 = vadd.xlane.f32.xlu0 %v245_v54 }
 0x239   :  { %262 = vadd.xlane.f32.xlu0 %v261_v9 }
 0x2be   :  { %v227_v55 = vpop.xlane.xlu0 %226 }
 0x2bf   :  { %v228_v56 = vrot.slane %v227_v55, 4 }
 0x2c1   :  { %v229_v57 = vadd.f32 %v228_v56, %v227_v55 }
 0x2c2   :  { %v247_v58 = vpop.xlane.xlu0 %246 }
 0x2c3   :  { %v230_v59 = vrot.slane %v229_v57, 2  ;;  %v248_v60 = vrot.slane %v247_v58, 4 }
 0x2c5   :  { %v249_v61 = vadd.f32 %v248_v60, %v247_v58  ;;  %v231_v62 = vadd.f32 %v230_v59, %v229_v57 }
 0x2c6   :  { %v263_v63 = vpop.xlane.xlu0 %262 }
 0x2c7   :  { %v250_v0 = vrot.slane %v249_v61, 2  ;;  %v264_v1 = vrot.slane %v263_v63, 4  ;;  %v232_v2 = vrot.slane %v231_v62, 1 }
 0x2c9   :  { %v265_v3 = vadd.f32 %v264_v1, %v263_v63  ;;  %v233_v4 = vadd.f32 %v232_v2, %v231_v62  ;;  %v251_v5 = vadd.f32 %v250_v0, %v249_v61 }
 0x2cb   :  { %v266_v6 = vrot.slane %v265_v3, 2  ;;  %326 = vpush %v233_v4  ;;  %v252_v7 = vrot.slane %v251_v5, 1 }
 0x2cd   :  { %v267_v8 = vadd.f32 %v266_v6, %v265_v3  ;;  %v253_v9 = vadd.f32 %v252_v7, %v251_v5 }
 0x2cf   :  { %328 = vpush %v253_v9  ;;  %v268_v10 = vrot.slane %v267_v8, 1 }
 0x2d1   :  { %v269_v11 = vadd.f32 %v268_v10, %v267_v8 }
 0x2d3   :  { %330 = vpush %v269_v11 }
 0x2fc   :  { %s327_s2 = spop %326 }
 0x2fd   :  { %v278_v15 = vstv %s327_s2 }
 0x300   :  { %s329_s26 = spop %328 }
 0x301   :  { %v276_v13 = vstv %s329_s26 }
 0x304   :  { %s331_s27 = spop %330 }
 0x305   :  { %v274_v12 = vstv %s331_s27 }
 0x306   :  { %v275_v14 = vsel %vm273_vm11, %v274_v12, 0.0 }
 0x307   :  { %v277_v16 = vsel %vm272_vm12, %v276_v13, %v275_v14 }
 0x308   :  { %v279_v17 = vsel %vm271_vm13, %v278_v15, %v277_v16 }
 0x309   :  { %280 = vst [vmem:[#allocation2] sm:$0x1] %v279_v17 }
 0x30a   :  { %374 = shalt.err (!%p371_p4)
}
 0x30b   :  { %s375_s7 = scalar_lea.hbm %s494_s3, 16 }
 0x30c   :  { %p376_p5 = scmp.ne.s32.totalorder %s494_s3, %s375_s7  ;;  %p379_p6 = scmp.lt.u32.totalorder %s375_s7, %s494_s3 }
 0x30e   :  { %p381_p7 = pnand %p379_p6, %p376_p5 }
 0x310   :  { %384 = shalt.err (!%p381_p7)
}
 0x311   :  { %290 = dma.vmem_to_hbm [thread:$0]  %s288_s29, 16, %s494_s3, [#allocation3]  }
 0x312   :  { %385 = dma.done.wait [#allocation3], 16  }
 0x313   :  { %386 = vsyncadd [#allocation3], 4294967280 }
 0x314   :  { %294 = vsyncpa [#allocation3], 1 }

</bundles_post_ra>
